<compile_context>
chip_gen: v7x
topology: tpu7x:2x2x1
jax: 0.10.0
libtpu: 0.0.40
codegen_flags: <defaults>
</compile_context>

<pallas_src>
import jax
import jax.numpy as jnp
from jax.experimental import pallas as pl
from jax.experimental.pallas import tpu as pltpu

HIDDEN = 128      # fc1 output dim (fixed by the PyTorch module)
OUT_DIM = 64      # fc2 output dim (default out_dim=64)
LANES = 128       # TPU lane width


def _round_up(x, m):
    return ((x + m - 1) // m) * m


def make_user_tower_kernel(n_cols, n_num, cat_total, k_pad, mm_dtype):
    """Fused kernel: one-hot/numeric activation block -> fc1 -> ReLU -> fc2 -> ReLU."""

    def kernel(ids_ref, num_ref, w1_ref, b1_ref, w2_ref, b2_ref, o_ref):
        tile_b = num_ref.shape[0]
        ids = ids_ref[...]                    # (tile_b, n_cols) int32, already K-offsetted
        num = num_ref[...]                    # (tile_b, n_num)  f32

        # Single resident iota over the fused K dimension.
        iota = jax.lax.broadcasted_iota(jnp.int32, (tile_b, k_pad), 1)

        # Categorical one-hots: disjoint lane segments, so a plain sum of compares.
        x = jnp.zeros((tile_b, k_pad), jnp.float32)
        for c in range(n_cols):
            x = x + (iota == ids[:, c:c + 1]).astype(jnp.float32)
        # Numerical features occupy lanes [cat_total, cat_total + n_num).
        for k in range(n_num):
            x = jnp.where(iota == (cat_total + k), num[:, k:k + 1], x)

        # fc1: ONE MXU pass against the fused (k_pad, HIDDEN) weight; f32 accumulate.
        acc = jnp.dot(x.astype(mm_dtype), w1_ref[...],
                      preferred_element_type=jnp.float32) + b1_ref[...]
        h = jnp.maximum(acc, 0.0)             # F.relu(fc1(x))

        # fc2 (HIDDEN -> out_dim), f32 accumulate.
        y = jnp.dot(h.astype(mm_dtype), w2_ref[...],
                    preferred_element_type=jnp.float32) + b2_ref[...]
        o_ref[...] = jnp.maximum(y, 0.0)      # F.relu(fc2(h))

    return kernel


def user_tower_forward(user_cat, user_num, params, *, tile_b=1024, use_bf16_matmul=False):
    """Forward pass matching UserTower.forward semantics.

    user_cat: dict[str, int32[B]] categorical ids (dict order == concat order, as in PyTorch).
    user_num: float32[B, num_numerical_features].
    """
    cols = list(user_cat.keys())
    vocabs = [int(params["emb"][c].shape[0]) for c in cols]
    embed_dims = [int(params["emb"][c].shape[1]) for c in cols]
    n_cols = len(cols)
    n_num = int(user_num.shape[1])

    w1 = params["w1"].astype(jnp.float32)                 # (d_in, HIDDEN)
    hidden = int(w1.shape[1])
    out_dim = int(params["w2"].shape[1])

    # --- fold each embedding table with its fc1 slice and stack into ONE fused W1 ---
    blocks = []
    row_off = 0
    for c, ed in zip(cols, embed_dims):
        blocks.append(jnp.dot(params["emb"][c].astype(jnp.float32),
                              w1[row_off:row_off + ed, :],
                              precision=jax.lax.Precision.HIGHEST))   # (vocab_c, HIDDEN)
        row_off += ed
    blocks.append(w1[row_off:row_off + n_num, :])          # numeric slice
    cat_total = sum(vocabs)
    k_total = cat_total + n_num
    k_pad = _round_up(k_total, LANES)
    if k_pad > k_total:
        blocks.append(jnp.zeros((k_pad - k_total, hidden), jnp.float32))
    w1f = jnp.concatenate(blocks, axis=0)                  # (k_pad, HIDDEN)

    b1 = params["b1"].reshape(1, hidden).astype(jnp.float32)
    w2 = params["w2"].astype(jnp.float32)                  # (HIDDEN, out_dim), no padding
    b2 = params["b2"].reshape(1, out_dim).astype(jnp.float32)

    mm_dtype = jnp.bfloat16 if use_bf16_matmul else jnp.float32
    w1f = w1f.astype(mm_dtype)
    w2 = w2.astype(mm_dtype)

    # --- ids with cumulative vocab offsets baked in (single-iota one-hot in kernel) ---
    offsets = []
    off = 0
    for v in vocabs:
        offsets.append(off)
        off += v
    ids = jnp.stack([user_cat[c].astype(jnp.int32) for c in cols], axis=1)   # (B, n_cols)
    ids = ids + jnp.asarray(offsets, jnp.int32)[None, :]
    x_num = user_num.astype(jnp.float32)

    # --- batch tiling: big tile, but keep >= 2 grid steps (v7x megacore) when B > 8 ---
    B = int(user_num.shape[0])
    tile = max(8, min(tile_b, _round_up((B + 1) // 2, 8)))
    b_pad = _round_up(B, tile)
    if b_pad != B:
        ids = jnp.pad(ids, ((0, b_pad - B), (0, 0)))       # padded rows are sliced off
        x_num = jnp.pad(x_num, ((0, b_pad - B), (0, 0)))
    grid = (b_pad // tile,)

    in_specs = [
        pl.BlockSpec((tile, n_cols), lambda i: (i, 0)),    # offsetted ids tile
        pl.BlockSpec((tile, n_num), lambda i: (i, 0)),     # numeric tile
        pl.BlockSpec((k_pad, hidden), lambda i: (0, 0)),   # fused W1 (resident)
        pl.BlockSpec((1, hidden), lambda i: (0, 0)),       # b1
        pl.BlockSpec((hidden, out_dim), lambda i: (0, 0)), # W2
        pl.BlockSpec((1, out_dim), lambda i: (0, 0)),      # b2
    ]

    wdtype_bytes = jnp.dtype(mm_dtype).itemsize
    weight_bytes = wdtype_bytes * (int(w1f.size) + int(w2.size)) + 4 * (int(b1.size) + int(b2.size))
    cost = pl.CostEstimate(
        flops=2 * b_pad * (k_pad * hidden + hidden * out_dim),
        transcendentals=0,
        bytes_accessed=4 * (int(ids.size) + int(x_num.size) + b_pad * out_dim) + weight_bytes,
    )

    out = pl.pallas_call(
        make_user_tower_kernel(n_cols, n_num, cat_total, k_pad, mm_dtype),
        out_shape=jax.ShapeDtypeStruct((b_pad, out_dim), jnp.float32),
        grid_spec=pltpu.PrefetchScalarGridSpec(
            num_scalar_prefetch=0,
            grid=grid,
            in_specs=in_specs,
            out_specs=pl.BlockSpec((tile, out_dim), lambda i: (i, 0)),
        ),
        compiler_params=pltpu.CompilerParams(
            dimension_semantics=("parallel",)),
        cost_estimate=cost,
    )(ids, x_num, w1f, b1, w2, b2)

    return out[:B]


def init_params(key, vocab_sizes, embed_dims, num_numerical):
    """Deterministic synthetic parameter init (mirrors module __init__ shapes)."""
    params = {"emb": {}}
    for col in vocab_sizes:
        key, k = jax.random.split(key)
        dim = embed_dims.get(col, 8)
        params["emb"][col] = jax.random.normal(
            k, (vocab_sizes[col], dim), dtype=jnp.float32) * 0.1

    total_cat_dim = sum(embed_dims.get(col, 8) for col in vocab_sizes)
    d_in = total_cat_dim + num_numerical

    key, k1, k2, k3, k4 = jax.random.split(key, 5)
    params["w1"] = jax.random.normal(k1, (d_in, HIDDEN), dtype=jnp.float32) * 0.05
    params["b1"] = jax.random.normal(k2, (HIDDEN,), dtype=jnp.float32) * 0.05
    params["w2"] = jax.random.normal(k3, (HIDDEN, OUT_DIM), dtype=jnp.float32) * 0.05
    params["b2"] = jax.random.normal(k4, (OUT_DIM,), dtype=jnp.float32) * 0.05
    return params


def reference_forward(user_cat, user_num, params):
    """Pure-JAX reference mirroring the PyTorch forward exactly."""
    embeds = [jnp.take(params["emb"][col], user_cat[col], axis=0) for col in user_cat]
    x = jnp.concatenate(embeds + [user_num], axis=1).astype(jnp.float32)
    h = jnp.maximum(x @ params["w1"] + params["b1"], 0.0)
    return jnp.maximum(h @ params["w2"] + params["b2"], 0.0)


if __name__ == "__main__":
    key = jax.random.PRNGKey(0)

    vocab_sizes = {"gender": 4, "age_group": 10, "country": 16}
    embed_dims = {"gender": 8, "age_group": 8, "country": 8}   # default 8 per column
    num_numerical = 8
    batch = 20   # deliberately NOT a tile multiple -> exercises batch padding

    key, kp = jax.random.split(key)
    params = init_params(kp, vocab_sizes, embed_dims, num_numerical)

    user_cat = {}
    for col in vocab_sizes:
        key, k = jax.random.split(key)
        user_cat[col] = jax.random.randint(
            k, (batch,), 0, vocab_sizes[col], dtype=jnp.int32)
    key, kn = jax.random.split(key)
    user_num = jax.random.normal(kn, (batch, num_numerical), dtype=jnp.float32)

    ref = reference_forward(user_cat, user_num, params)

    # Default config: f32 path, >=2 grid steps even at this tiny batch.
    out = jax.block_until_ready(user_tower_forward(user_cat, user_num, params))
    assert out.shape == (batch, OUT_DIM)
    assert jnp.allclose(out, ref, atol=1e-5, rtol=1e-4), "mismatch vs reference (default)"

    # Small tile: exercises the multi-step grid + padded-final-tile path.
    out2 = jax.block_until_ready(
        user_tower_forward(user_cat, user_num, params, tile_b=8))
    assert jnp.allclose(out2, ref, atol=1e-5, rtol=1e-4), "mismatch vs reference (tile_b=8)"

    # bf16 MXU-operand path (v6e/v7x suggestion); looser tolerance for bf16 operands.
    out3 = jax.block_until_ready(
        user_tower_forward(user_cat, user_num, params, use_bf16_matmul=True))
    assert jnp.allclose(out3, ref, atol=1e-2, rtol=1e-1), "mismatch vs reference (bf16)"

    print("KERNEL_OK")
</pallas_src>

<mosaic_0001>
module attributes {stable_mosaic.version = 11 : i64} {
  func.func @kernel(%arg0: i32, %arg1: memref<16x3xi32, #tpu.memory_space<vmem>>, %arg2: memref<16x8xf32, #tpu.memory_space<vmem>>, %arg3: memref<128x128xf32, #tpu.memory_space<vmem>>, %arg4: memref<1x128xf32, #tpu.memory_space<vmem>>, %arg5: memref<128x64xf32, #tpu.memory_space<vmem>>, %arg6: memref<1x64xf32, #tpu.memory_space<vmem>>, %arg7: memref<16x64xf32, #tpu.memory_space<vmem>>) attributes {dimension_semantics = [#tpu.dimension_semantics<parallel>], iteration_bounds = array<i64: 2>, scalar_prefetch = 0 : i64, scratch_operands = 0 : i64, tpu.core_type = #tpu.core_type<tc>, window_params = [{transform_indices = @transform_0, window_bounds = array<i64: 16, 3>}, {transform_indices = @transform_1, window_bounds = array<i64: 16, 8>}, {pipeline_mode = #tpu.pipeline_mode<synchronous>, transform_indices = @transform_2, window_bounds = array<i64: 128, 128>}, {pipeline_mode = #tpu.pipeline_mode<synchronous>, transform_indices = @transform_3, window_bounds = array<i64: 1, 128>}, {pipeline_mode = #tpu.pipeline_mode<synchronous>, transform_indices = @transform_4, window_bounds = array<i64: 128, 64>}, {pipeline_mode = #tpu.pipeline_mode<synchronous>, transform_indices = @transform_5, window_bounds = array<i64: 1, 64>}, {transform_indices = @transform_6, window_bounds = array<i64: 16, 64>}]} {
    %c0 = arith.constant 0 : index
    %c0_0 = arith.constant 0 : index
    %0 = vector.load %arg1[%c0, %c0_0] : memref<16x3xi32, #tpu.memory_space<vmem>>, vector<16x3xi32>
    %c0_1 = arith.constant 0 : index
    %c0_2 = arith.constant 0 : index
    %1 = vector.load %arg2[%c0_1, %c0_2] : memref<16x8xf32, #tpu.memory_space<vmem>>, vector<16x8xf32>
    %2 = tpu.iota {dimensions = array<i32: 1>} : vector<16x128xi32>
    %cst = arith.constant 0.000000e+00 : f32
    %3 = vector.broadcast %cst : f32 to vector<16x128xf32>
    %4 = vector.extract_strided_slice %0 {offsets = [0, 0], sizes = [16, 1], strides = [1, 1]} : vector<16x3xi32> to vector<16x1xi32>
    %5 = vector.broadcast %4 : vector<16x1xi32> to vector<16x128xi32>
    %6 = arith.cmpi eq, %2, %5 : vector<16x128xi32>
    %7 = arith.extui %6 : vector<16x128xi1> to vector<16x128xi32>
    %8 = arith.sitofp %7 : vector<16x128xi32> to vector<16x128xf32>
    %9 = arith.addf %3, %8 : vector<16x128xf32>
    %10 = vector.extract_strided_slice %0 {offsets = [0, 1], sizes = [16, 1], strides = [1, 1]} : vector<16x3xi32> to vector<16x1xi32>
    %11 = vector.broadcast %10 : vector<16x1xi32> to vector<16x128xi32>
    %12 = arith.cmpi eq, %2, %11 : vector<16x128xi32>
    %13 = arith.extui %12 : vector<16x128xi1> to vector<16x128xi32>
    %14 = arith.sitofp %13 : vector<16x128xi32> to vector<16x128xf32>
    %15 = arith.addf %9, %14 : vector<16x128xf32>
    %16 = vector.extract_strided_slice %0 {offsets = [0, 2], sizes = [16, 1], strides = [1, 1]} : vector<16x3xi32> to vector<16x1xi32>
    %17 = vector.broadcast %16 : vector<16x1xi32> to vector<16x128xi32>
    %18 = arith.cmpi eq, %2, %17 : vector<16x128xi32>
    %19 = arith.extui %18 : vector<16x128xi1> to vector<16x128xi32>
    %20 = arith.sitofp %19 : vector<16x128xi32> to vector<16x128xf32>
    %21 = arith.addf %15, %20 : vector<16x128xf32>
    %c30_i32 = arith.constant 30 : i32
    %22 = vector.broadcast %c30_i32 : i32 to vector<16x128xi32>
    %23 = arith.cmpi eq, %2, %22 : vector<16x128xi32>
    %24 = vector.extract_strided_slice %1 {offsets = [0, 0], sizes = [16, 1], strides = [1, 1]} : vector<16x8xf32> to vector<16x1xf32>
    %25 = vector.shape_cast %24 : vector<16x1xf32> to vector<16x1xf32>
    %26 = vector.broadcast %25 : vector<16x1xf32> to vector<16x128xf32>
    %27 = arith.select %23, %26, %21 : vector<16x128xi1>, vector<16x128xf32>
    %c31_i32 = arith.constant 31 : i32
    %28 = vector.broadcast %c31_i32 : i32 to vector<16x128xi32>
    %29 = arith.cmpi eq, %2, %28 : vector<16x128xi32>
    %30 = vector.extract_strided_slice %1 {offsets = [0, 1], sizes = [16, 1], strides = [1, 1]} : vector<16x8xf32> to vector<16x1xf32>
    %31 = vector.shape_cast %30 : vector<16x1xf32> to vector<16x1xf32>
    %32 = vector.broadcast %31 : vector<16x1xf32> to vector<16x128xf32>
    %33 = arith.select %29, %32, %27 : vector<16x128xi1>, vector<16x128xf32>
    %c32_i32 = arith.constant 32 : i32
    %34 = vector.broadcast %c32_i32 : i32 to vector<16x128xi32>
    %35 = arith.cmpi eq, %2, %34 : vector<16x128xi32>
    %36 = vector.extract_strided_slice %1 {offsets = [0, 2], sizes = [16, 1], strides = [1, 1]} : vector<16x8xf32> to vector<16x1xf32>
    %37 = vector.shape_cast %36 : vector<16x1xf32> to vector<16x1xf32>
    %38 = vector.broadcast %37 : vector<16x1xf32> to vector<16x128xf32>
    %39 = arith.select %35, %38, %33 : vector<16x128xi1>, vector<16x128xf32>
    %c33_i32 = arith.constant 33 : i32
    %40 = vector.broadcast %c33_i32 : i32 to vector<16x128xi32>
    %41 = arith.cmpi eq, %2, %40 : vector<16x128xi32>
    %42 = vector.extract_strided_slice %1 {offsets = [0, 3], sizes = [16, 1], strides = [1, 1]} : vector<16x8xf32> to vector<16x1xf32>
    %43 = vector.shape_cast %42 : vector<16x1xf32> to vector<16x1xf32>
    %44 = vector.broadcast %43 : vector<16x1xf32> to vector<16x128xf32>
    %45 = arith.select %41, %44, %39 : vector<16x128xi1>, vector<16x128xf32>
    %c34_i32 = arith.constant 34 : i32
    %46 = vector.broadcast %c34_i32 : i32 to vector<16x128xi32>
    %47 = arith.cmpi eq, %2, %46 : vector<16x128xi32>
    %48 = vector.extract_strided_slice %1 {offsets = [0, 4], sizes = [16, 1], strides = [1, 1]} : vector<16x8xf32> to vector<16x1xf32>
    %49 = vector.shape_cast %48 : vector<16x1xf32> to vector<16x1xf32>
    %50 = vector.broadcast %49 : vector<16x1xf32> to vector<16x128xf32>
    %51 = arith.select %47, %50, %45 : vector<16x128xi1>, vector<16x128xf32>
    %c35_i32 = arith.constant 35 : i32
    %52 = vector.broadcast %c35_i32 : i32 to vector<16x128xi32>
    %53 = arith.cmpi eq, %2, %52 : vector<16x128xi32>
    %54 = vector.extract_strided_slice %1 {offsets = [0, 5], sizes = [16, 1], strides = [1, 1]} : vector<16x8xf32> to vector<16x1xf32>
    %55 = vector.shape_cast %54 : vector<16x1xf32> to vector<16x1xf32>
    %56 = vector.broadcast %55 : vector<16x1xf32> to vector<16x128xf32>
    %57 = arith.select %53, %56, %51 : vector<16x128xi1>, vector<16x128xf32>
    %c36_i32 = arith.constant 36 : i32
    %58 = vector.broadcast %c36_i32 : i32 to vector<16x128xi32>
    %59 = arith.cmpi eq, %2, %58 : vector<16x128xi32>
    %60 = vector.extract_strided_slice %1 {offsets = [0, 6], sizes = [16, 1], strides = [1, 1]} : vector<16x8xf32> to vector<16x1xf32>
    %61 = vector.shape_cast %60 : vector<16x1xf32> to vector<16x1xf32>
    %62 = vector.broadcast %61 : vector<16x1xf32> to vector<16x128xf32>
    %63 = arith.select %59, %62, %57 : vector<16x128xi1>, vector<16x128xf32>
    %c37_i32 = arith.constant 37 : i32
    %64 = vector.broadcast %c37_i32 : i32 to vector<16x128xi32>
    %65 = arith.cmpi eq, %2, %64 : vector<16x128xi32>
    %66 = vector.extract_strided_slice %1 {offsets = [0, 7], sizes = [16, 1], strides = [1, 1]} : vector<16x8xf32> to vector<16x1xf32>
    %67 = vector.shape_cast %66 : vector<16x1xf32> to vector<16x1xf32>
    %68 = vector.broadcast %67 : vector<16x1xf32> to vector<16x128xf32>
    %69 = arith.select %65, %68, %63 : vector<16x128xi1>, vector<16x128xf32>
    %c0_3 = arith.constant 0 : index
    %c0_4 = arith.constant 0 : index
    %70 = vector.load %arg3[%c0_3, %c0_4] : memref<128x128xf32, #tpu.memory_space<vmem>>, vector<128x128xf32>
    %cst_5 = arith.constant dense<0.000000e+00> : vector<16x128xf32>
    %71 = tpu.matmul %69, %70, %cst_5 {dimension_numbers = #tpu.dot_dimension_numbers<[1], [0], [0], [1], [0, 0, 1, 1], [], []>} : vector<16x128xf32>, vector<128x128xf32>, vector<16x128xf32> -> vector<16x128xf32>
    %c0_6 = arith.constant 0 : index
    %c0_7 = arith.constant 0 : index
    %72 = vector.load %arg4[%c0_6, %c0_7] : memref<1x128xf32, #tpu.memory_space<vmem>>, vector<1x128xf32>
    %73 = vector.broadcast %72 : vector<1x128xf32> to vector<16x128xf32>
    %74 = arith.addf %71, %73 : vector<16x128xf32>
    %cst_8 = arith.constant 0.000000e+00 : f32
    %75 = vector.broadcast %cst_8 : f32 to vector<16x128xf32>
    %76 = arith.maximumf %74, %75 : vector<16x128xf32>
    %c0_9 = arith.constant 0 : index
    %c0_10 = arith.constant 0 : index
    %77 = vector.load %arg5[%c0_9, %c0_10] : memref<128x64xf32, #tpu.memory_space<vmem>>, vector<128x64xf32>
    %cst_11 = arith.constant dense<0.000000e+00> : vector<16x64xf32>
    %78 = tpu.matmul %76, %77, %cst_11 {dimension_numbers = #tpu.dot_dimension_numbers<[1], [0], [0], [1], [0, 0, 1, 1], [], []>} : vector<16x128xf32>, vector<128x64xf32>, vector<16x64xf32> -> vector<16x64xf32>
    %c0_12 = arith.constant 0 : index
    %c0_13 = arith.constant 0 : index
    %79 = vector.load %arg6[%c0_12, %c0_13] : memref<1x64xf32, #tpu.memory_space<vmem>>, vector<1x64xf32>
    %80 = vector.broadcast %79 : vector<1x64xf32> to vector<16x64xf32>
    %81 = arith.addf %78, %80 : vector<16x64xf32>
    %cst_14 = arith.constant 0.000000e+00 : f32
    %82 = vector.broadcast %cst_14 : f32 to vector<16x64xf32>
    %83 = arith.maximumf %81, %82 : vector<16x64xf32>
    %c0_15 = arith.constant 0 : index
    %c0_16 = arith.constant 0 : index
    %84 = vector.load %arg7[%c0_15, %c0_16] : memref<16x64xf32, #tpu.memory_space<vmem>>, vector<16x64xf32>
    tpu.vector_store %arg7[%c0_15, %c0_16], %83 {strides = array<i32>} : memref<16x64xf32, #tpu.memory_space<vmem>>, vector<16x64xf32>,
    return
  }
  func.func @transform_0(%arg0: i32) -> (i32, i32) {
    %c0_i32 = arith.constant 0 : i32
    %c0_i32_0 = arith.constant 0 : i32
    return %arg0, %c0_i32 : i32, i32
  }
  func.func @transform_1(%arg0: i32) -> (i32, i32) {
    %c0_i32 = arith.constant 0 : i32
    %c0_i32_0 = arith.constant 0 : i32
    return %arg0, %c0_i32 : i32, i32
  }
  func.func @transform_2(%arg0: i32) -> (i32, i32) {
    %c0_i32 = arith.constant 0 : i32
    %c0_i32_0 = arith.constant 0 : i32
    %c0_i32_1 = arith.constant 0 : i32
    return %c0_i32, %c0_i32_0 : i32, i32
  }
  func.func @transform_3(%arg0: i32) -> (i32, i32) {
    %c0_i32 = arith.constant 0 : i32
    %c0_i32_0 = arith.constant 0 : i32
    %c0_i32_1 = arith.constant 0 : i32
    return %c0_i32, %c0_i32_0 : i32, i32
  }
  func.func @transform_4(%arg0: i32) -> (i32, i32) {
    %c0_i32 = arith.constant 0 : i32
    %c0_i32_0 = arith.constant 0 : i32
    %c0_i32_1 = arith.constant 0 : i32
    return %c0_i32, %c0_i32_0 : i32, i32
  }
  func.func @transform_5(%arg0: i32) -> (i32, i32) {
    %c0_i32 = arith.constant 0 : i32
    %c0_i32_0 = arith.constant 0 : i32
    %c0_i32_1 = arith.constant 0 : i32
    return %c0_i32, %c0_i32_0 : i32, i32
  }
  func.func @transform_6(%arg0: i32) -> (i32, i32) {
    %c0_i32 = arith.constant 0 : i32
    %c0_i32_0 = arith.constant 0 : i32
    return %arg0, %c0_i32 : i32, i32
  }
}

</mosaic_0001>

<bundles_post_ra>
// kernel: tpu_custom_call.1
= control target key start
LH: loop header
LB: loop body
LE: loop exit
PB: predicated region body
PF: predicated region fallthrough
CT: control target
= control target key end

     0   :  { %11 = vsyncpa [#allocation3], 0  ;;  %s1338_s0 = inlined_call_operand.vmem [shape: s32[32,3], index: 0, kind: input, shape index: {}]   ;;  %s1339_s1 = inlined_call_operand.vmem [shape: f32[32,8], index: 1, kind: input, shape index: {}]   ;;  %s1340_s2 = inlined_call_operand.vmem [shape: f32[128,128], index: 2, kind: input, shape index: {}]   ;;  %s1341_s3 = inlined_call_operand.vmem [shape: f32[1,128], index: 3, kind: input, shape index: {}]   ;;  %s1342_s4 = inlined_call_operand.vmem [shape: f32[128,64], index: 4, kind: input, shape index: {}]   ;;  %s1343_s5 = inlined_call_operand.vmem [shape: f32[1,64], index: 5, kind: input, shape index: {}]   ;;  %s1344_s6 = inlined_call_operand.hbm [shape: f32[32,64], index: 6, kind: output, shape index: {}]  }
   0x1   :  { %13 = vsyncpa [#allocation3 + $0x1], 0  ;;  %s1111_s21 = smov 0   ;;  %s1113_s22 = smov 0  }
   0x2   :  { %s1115_s23 = smov 0   ;;  %s1117_s24 = smov 0  }
   0x3 LB: > { %s1132_s25 = sadd.s32 4294967295, %s1062_s24   ;;  %s704_s26 = sadd.s32 4294967294, %s1062_s24   ;;  %s1062_s24 = sphi %s1117_s24, %s1350_s24   ;;  %s1058_s23 = sphi %s1115_s23, %s1349_s23   ;;  %s1054_s22 = sphi %s1113_s22, %s1348_s22   ;;  %s1050_s21 = sphi %s1111_s21, %s1347_s21  }
   0x4   : > { %s1136_s27 = sadd.s32 1, %s1062_s24   ;;  %s162_s28 = sadd.s32 1, %s1058_s23 }
   0x5   : > { %s159_s29 = ssub.s32 %s1062_s24, %s1136_s27  ;;  %p172_p0 = scmp.ne.s32.totalorder %s1058_s23, %s1054_s22 }
   0x6   : > { %p160_p1 = scmp.eq.s32.totalorder %s159_s29, 0  ;;  %p173_p2 = scmp.eq.s32.totalorder %s1132_s25, 1 }
   0x7   : > { %p178_p3 = scmp.ne.s32.totalorder %s1054_s22, %s1050_s21  ;;  %p179_p4 = scmp.eq.s32.totalorder %s704_s26, 1 }
   0x8   : > { %s1147_s30 = scalar_select %p160_p1, %s1058_s23, %s162_s28  }
   0x9   : > { %p1149_p5 = por %p173_p2, %p172_p0  ;;  %p1153_p6 = por %p179_p4, %p178_p3 }
   0xa   : > { %p707_p7 = scmp.ge.s32.totalorder %s1062_s24, 1  ;;  %p227_p8 = scmp.lt.s32.totalorder %s1062_s24, 3 }
   0xc   : > { %p228_p9 = pnand %p707_p7, %p227_p8 }
   0xd   : > { %s709_s9 = sshll.u32 (!%p228_p9), %s1132_s25, 1  ;;  %v1064_v0 = vmov (!%p228_p9), 0   ;;  %v1065_v3 = vmov (!%p228_p9), 1   ;;  %v413_v4 = vld [vmem:[%s1340_s2] sm:$0xff] (!%p228_p9)  ;;  %v414_v5 = vld [vmem:[%s1340_s2 + $0x8] sm:$0xff] (!%p228_p9)  ;;  %v1066_v9 = vmov (!%p228_p9), 2   ;;  %v279_v61 = vlaneseq (!%p228_p9) }
   0xe   : > { %231 = sbr.rel (%p228_p9) target bundleno = 643 (0x283), region = 44  ;;  %949 = vset.pattern.permute.xlu1 (!%p228_p9), %v1064_v0  ;;  %947 = vset.pattern.permute.xlu0 (!%p228_p9), %v1064_v0  ;;  %p263_p10 = scmp.lt.s32.totalorder (!%p228_p9), %s709_s9, 3  ;;  %v833_v6 = vpack.c.bf16 (!%p228_p9), %v414_v5, %v413_v4  ;;  %v415_v10 = vld [vmem:[%s1340_s2 + $0x10] sm:$0xff] (!%p228_p9)  ;;  %v416_v11 = vld [vmem:[%s1340_s2 + $0x18] sm:$0xff] (!%p228_p9)  ;;  %v417_v14 = vld [vmem:[%s1340_s2 + $0x20] sm:$0xff] (!%p228_p9)  ;;  %v1067_v19 = vmov (!%p228_p9), 4  }
   0xf   : > { %v837_v13 = vpack.c.bf16 (!%p228_p9), %v416_v11, %v415_v10  ;;  %v418_v15 = vld [vmem:[%s1340_s2 + $0x28] sm:$0xff] (!%p228_p9)  ;;  %v419_v17 = vld [vmem:[%s1340_s2 + $0x30] sm:$0xff] (!%p228_p9)  ;;  %v420_v18 = vld [vmem:[%s1340_s2 + $0x38] sm:$0xff] (!%p228_p9)  ;;  %v1068_v24 = vmov (!%p228_p9), 3   ;;  %v1069_v25 = vmov (!%p228_p9), 7   ;;  %v1070_v29 = vmov (!%p228_p9), 5  }
  0x10   : > { %834 = vmatprep.subr.bf16.mxu0 (!%p228_p9), %v833_v6  ;;  %v841_v16 = vpack.c.bf16 (!%p228_p9), %v418_v15, %v417_v14  ;;  %v845_v20 = vpack.c.bf16 (!%p228_p9), %v420_v18, %v419_v17  ;;  %v421_v21 = vld [vmem:[%s1340_s2 + $0x40] sm:$0xff] (!%p228_p9)  ;;  %v422_v22 = vld [vmem:[%s1340_s2 + $0x48] sm:$0xff] (!%p228_p9)  ;;  %v423_v26 = vld [vmem:[%s1340_s2 + $0x50] sm:$0xff] (!%p228_p9)  ;;  %v1071_v33 = vmov (!%p228_p9), 6   ;;  %s259_s29 = sand.u32 (!%p228_p9), 1, %s1054_s22   ;;  %s726_s14 = sshll.u32 (!%p228_p9), %s1132_s25, 8 }
  0x11   : > { %836 = vmatpush3.bf16.msra.mxu0 (!%p228_p9), %v833_v6  ;;  %v849_v23 = vpack.c.bf16 (!%p228_p9), %v422_v22, %v421_v21  ;;  %v424_v27 = vld [vmem:[%s1340_s2 + $0x58] sm:$0xff] (!%p228_p9)  ;;  %v425_v30 = vld [vmem:[%s1340_s2 + $0x60] sm:$0xff] (!%p228_p9)  ;;  %v426_v31 = vld [vmem:[%s1340_s2 + $0x68] sm:$0xff] (!%p228_p9)  ;;  %vm613_vm14 = vcmask (!%p228_p9), 523264   ;;  %s1295_s17 = scalar_lea.hbm (!%p228_p9), %s1344_s6, %s726_s14  ;;  %s1297_s18 = scalar_lea.sflag (!%p228_p9), [#allocation3], %s259_s29 }
  0x12   : > { %838 = vmatprep.subr.bf16.mxu0 (!%p228_p9), %v837_v13  ;;  %v853_v28 = vpack.c.bf16 (!%p228_p9), %v424_v27, %v423_v26  ;;  %v857_v32 = vpack.c.bf16 (!%p228_p9), %v426_v31, %v425_v30  ;;  %v427_v34 = vld [vmem:[%s1340_s2 + $0x70] sm:$0xff] (!%p228_p9)  ;;  %v428_v35 = vld [vmem:[%s1340_s2 + $0x78] sm:$0xff] (!%p228_p9)  ;;  %v513_v37 = vld [vmem:[%s1342_s4] sm:$0xff] (!%p228_p9)  ;;  %s1073_s19 = smov (!%p228_p9), [#allocation2]  }
  0x13   : > { %v861_v36 = vpack.c.bf16 (!%p228_p9), %v428_v35, %v427_v34  ;;  %v514_v38 = vld [vmem:[%s1342_s4 + $0x8] sm:$0xff] (!%p228_p9)  ;;  %v515_v39 = vld [vmem:[%s1342_s4 + $0x10] sm:$0xff] (!%p228_p9)  ;;  %v516_v41 = vld [vmem:[%s1342_s4 + $0x18] sm:$0xff] (!%p228_p9)  ;;  %s1004_s20 = sshll.u32 (!%p228_p9), %s1073_s19, 4  ;;  %s1005_s20 = int_to_ptr.vmem [resolvable:$false] %s1004_s20 }
  0x14   : > { %v865_v40 = vpack.c.bf16 (!%p228_p9), %v514_v38, %v513_v37  ;;  %v869_v42 = vpack.c.bf16 (!%p228_p9), %v516_v41, %v515_v39  ;;  %v517_v43 = vld [vmem:[%s1342_s4 + $0x20] sm:$0xff] (!%p228_p9)  ;;  %v518_v44 = vld [vmem:[%s1342_s4 + $0x28] sm:$0xff] (!%p228_p9)  ;;  %v519_v46 = vld [vmem:[%s1342_s4 + $0x30] sm:$0xff] (!%p228_p9)  ;;  %s1006_s26 = scalar_lea.vmem (!%p228_p9), %s1005_s20, 512 }
  0x15   : > { %s1352_s9 = smov (!%p263_p10, %s709_s9), 3  ;;  %840 = vmatpush3.bf16.msra.mxu0 %v837_v13  ;;  %v873_v45 = vpack.c.bf16 %v518_v44, %v517_v43  ;;  %v520_v47 = vld [vmem:[%s1342_s4 + $0x38] sm:$0xff]  ;;  %v521_v49 = vld [vmem:[%s1342_s4 + $0x40] sm:$0xff]  ;;  %v522_v50 = vld [vmem:[%s1342_s4 + $0x48] sm:$0xff] }
  0x16   : > { %s710_s10 = sshll.u32 %s1352_s9, 3  ;;  %842 = vmatprep.subr.bf16.mxu0 %v841_v16  ;;  %866 = vmatprep.subr.bf16.mxu1 %v865_v40  ;;  %v877_v48 = vpack.c.bf16 %v520_v47, %v519_v46  ;;  %v881_v51 = vpack.c.bf16 %v522_v50, %v521_v49  ;;  %v523_v52 = vld [vmem:[%s1342_s4 + $0x50] sm:$0xff]  ;;  %v524_v53 = vld [vmem:[%s1342_s4 + $0x58] sm:$0xff]  ;;  %v525_v55 = vld [vmem:[%s1342_s4 + $0x60] sm:$0xff]  ;;  %s708_s9 = sshll.u32 %s259_s29, 4 }
  0x17   : > { %s266_s13 = scalar_lea.vmem %s1338_s0, %s710_s10  ;;  %s272_s16 = scalar_lea.vmem %s1339_s1, %s710_s10  ;;  %868 = vmatpush3.bf16.msra.mxu1 %v865_v40  ;;  %v885_v54 = vpack.c.bf16 %v524_v53, %v523_v52  ;;  %v526_v56 = vld [vmem:[%s1342_s4 + $0x68] sm:$0xff]  ;;  %v527_v53 = vld [vmem:[%s1342_s4 + $0x70] sm:$0xff] }
  0x18   : > { %v276_v1 = vld [vmem:[%s266_s13 + $0x8] sm:$0xff]  ;;  %v275_v2 = vld [vmem:[%s266_s13] sm:$0xff]  ;;  %870 = vmatprep.subr.bf16.mxu1 %v869_v42  ;;  %v889_v57 = vpack.c.bf16 %v526_v56, %v525_v55  ;;  %s261_s12 = scalar_lea.vmem [#allocation2], %s708_s9 }
  0x19   : > { %285 = vperm.xlu1 %949, %v276_v1   ;;  %282 = vperm.xlu0 %947, %v275_v2   ;;  %v277_v7 = vld [vmem:[%s272_s16] sm:$0xff]  ;;  %v278_v8 = vld [vmem:[%s272_s16 + $0x8] sm:$0xff]  ;;  %s630_s13 = sshll.u32 %s261_s12, 4  ;;  %s1290_s13 = int_to_ptr.vmem [resolvable:$true] %s630_s13 }
  0x1a   : > { %v954_v12 = vpack.i.bf16 %v278_v8, %v277_v7  ;;  %844 = vmatpush3.bf16.msra.mxu0 %v841_v16  ;;  %v719_v56 = vld [vmem:[%s1341_s3] ss:$0 sm:$0xff]  ;;  %s1000_s25 = scalar_lea.vmem %s1290_s13, 256  ;;  %p1007_p0 = scmp.lt.s32.totalorder %s1290_s13, %s1005_s20 }
  0x1b   : > { %846 = vmatprep.subr.bf16.mxu0 %v845_v20  ;;  %872 = vmatpush3.bf16.msra.mxu1 %v869_v42  ;;  %p1001_p11 = scmp.ne.s32.totalorder %s1290_s13, %s1000_s25  ;;  %p1008_p1 = scmp.lt.s32.totalorder %s1006_s26, %s1000_s25 }
  0x1c   : > { %874 = vmatprep.subr.bf16.mxu1 %v873_v45 }
  0x1d   : > { %950 = vset.pattern.permute.xlu1 %v1065_v3  ;;  %948 = vset.pattern.permute.xlu0 %v1065_v3  ;;  %p1002_p12 = pnand %p1001_p11, %p1149_p5  ;;  %p1009_p2 = por %p1008_p1, %p1007_p0 }
  0x1e   : > { %299 = vperm.xlu1 %950, %v276_v1   ;;  %296 = vperm.xlu0 %948, %v275_v2  }
  0x1f   : > { %848 = vmatpush3.bf16.msra.mxu0 %v845_v20  ;;  %876 = vmatpush3.bf16.msra.mxu1 %v873_v45  ;;  %p1003_p13 = pneg %p1002_p12 }
  0x20   : > { %850 = vmatprep.subr.bf16.mxu0 %v849_v23  ;;  %878 = vmatprep.subr.bf16.mxu1 %v877_v48 }
  0x21   : > { %p1010_p3 = pnand %p1009_p2, %p1003_p13 }
  0x22   : > { %951 = vset.pattern.permute.xlu1 %v1066_v9  ;;  %952 = vset.pattern.permute.xlu0 %v1066_v9 }
  0x23   : > { %310 = vperm.xlu1 %951, %v275_v2   ;;  %313 = vperm.xlu0 %952, %v276_v1  }
  0x24   : > { %852 = vmatpush3.bf16.msra.mxu0 %v849_v23  ;;  %880 = vmatpush3.bf16.msra.mxu1 %v877_v48 }
  0x25   : > { %854 = vmatprep.subr.bf16.mxu0 %v853_v28  ;;  %882 = vmatprep.subr.bf16.mxu1 %v881_v51 }
  0x27   : > { %953 = vset.pattern.permute.xlu1 %v1064_v0  ;;  %966 = vperm.xlu0 %952, %v954_v12   ;;  %v1256_v0 = vand.u32 127, %v279_v61 }
  0x28   : > { %955 = vperm.xlu1 %953, %v954_v12   ;;  %856 = vmatpush3.bf16.msra.mxu0 %v853_v28 }
  0x29   : > { %858 = vmatprep.subr.bf16.mxu0 %v857_v32  ;;  %884 = vmatpush3.bf16.msra.mxu1 %v881_v51  ;;  %vm323_vm6 = vcmp.eq.s32.totalorder %v1256_v0, 30  ;;  %vm336_vm7 = vcmp.eq.s32.totalorder %v1256_v0, 31  ;;  %vm347_vm8 = vcmp.eq.s32.totalorder %v1256_v0, 32  ;;  %vm358_vm9 = vcmp.eq.s32.totalorder %v1256_v0, 33 }
  0x2a   : > { %886 = vmatprep.subr.bf16.mxu1 %v885_v54  ;;  %vm369_vm10 = vcmp.eq.s32.totalorder %v1256_v0, 34  ;;  %vm380_vm11 = vcmp.eq.s32.totalorder %v1256_v0, 35  ;;  %vm391_vm12 = vcmp.eq.s32.totalorder %v1256_v0, 36  ;;  %vm402_vm13 = vcmp.eq.s32.totalorder %v1256_v0, 37 }
  0x2b   : > { %976 = vset.pattern.permute.xlu0 %v1067_v19 }
  0x2c   : > { %959 = vset.pattern.permute.xlu1 %v1065_v3  ;;  %978 = vperm.xlu0 %976, %v954_v12   ;;  %v1072_v3 = vmov 0.0  }
  0x2d   : > { %961 = vperm.xlu1 %959, %v954_v12   ;;  %860 = vmatpush3.bf16.msra.mxu0 %v857_v32 }
  0x2e   : > { %862 = vmatprep.subr.bf16.mxu0 %v861_v36  ;;  %888 = vmatpush3.bf16.msra.mxu1 %v885_v54  ;;  %v528_v54 = vld [vmem:[%s1342_s4 + $0x78] sm:$0xff] }
  0x2f   : > { %890 = vmatprep.subr.bf16.mxu1 %v889_v57  ;;  %v893_v55 = vpack.c.bf16 %v528_v54, %v527_v53 }
  0x30   : > { %994 = vset.pattern.permute.xlu0 %v1069_v25 }
  0x31   : > { %970 = vset.pattern.permute.xlu1 %v1068_v24  ;;  %996 = vperm.xlu0 %994, %v954_v12  }
  0x32   : > { %972 = vperm.xlu1 %970, %v954_v12   ;;  %864 = vmatpush3.bf16.msra.mxu0 %v861_v36 }
  0x33   : > { %892 = vmatpush3.bf16.msra.mxu1 %v889_v57 }
  0x34   : > { %894 = vmatprep.subr.bf16.mxu1 %v893_v55 }
  0x36   : > { %982 = vset.pattern.permute.xlu1 %v1070_v29 }
  0x37   : > { %984 = vperm.xlu1 %982, %v954_v12   ;;  %896 = vmatpush3.bf16.msra.mxu1 %v893_v55 }
  0x3b   : > { %988 = vset.pattern.permute.xlu1 %v1071_v33 }
  0x3c   : > { %990 = vperm.xlu1 %988, %v954_v12  }
  0x98   : > { %v286_v58 = vpop.permute.xlu1 %285  ;;  %v283_v59 = vpop.permute.xlu0 %282 }
  0x99   : > { %vm287_vm0 = vcmp.eq.s32.totalorder %v1256_v0, %v283_v59  ;;  %vm288_vm3 = vcmp.eq.s32.totalorder %v1256_v0, %v286_v58 }
  0x9a   : > { %v713_v4 = vsel %vm287_vm0, 1.0, %v1072_v3  ;;  %v714_v10 = vsel %vm288_vm3, 1.0, %v1072_v3 }
  0x9d   : > { %v300_v60 = vpop.permute.xlu1 %299  ;;  %v297_v63 = vpop.permute.xlu0 %296 }
  0x9e   : > { %vm301_vm1 = vcmp.eq.s32.totalorder %v1256_v0, %v297_v63  ;;  %vm302_vm2 = vcmp.eq.s32.totalorder %v1256_v0, %v300_v60  ;;  %v720_v63 = vld [vmem:[%s1343_s5] ss:$0 sm:$0xff] }
  0x9f   : > { %v715_v5 = vsel %vm301_vm1, 1.0, %v1072_v3  ;;  %v716_v7 = vsel %vm302_vm2, 1.0, %v1072_v3 }
  0xa0   : > { %v307_v8 = vadd.f32 %v715_v5, %v713_v4  ;;  %v308_v13 = vadd.f32 %v716_v7, %v714_v10 }
  0xa2   : > { %v311_v62 = vpop.permute.xlu1 %310  ;;  %v314_v2 = vpop.permute.xlu0 %313 }
  0xa3   : > { %vm315_vm4 = vcmp.eq.s32.totalorder %v1256_v0, %v311_v62  ;;  %vm316_vm5 = vcmp.eq.s32.totalorder %v1256_v0, %v314_v2 }
  0xa4   : > { %v717_v11 = vsel %vm315_vm4, 1.0, %v1072_v3  ;;  %v718_v12 = vsel %vm316_vm5, 1.0, %v1072_v3 }
  0xa5   : > { %v321_v19 = vadd.f32 %v717_v11, %v307_v8  ;;  %v322_v20 = vadd.f32 %v718_v12, %v308_v13 }
  0xa6   : > { %v967_v9 = vpop.permute.xlu0 %966 }
  0xa7   : > { %v956_v1 = vpop.permute.xlu1 %955  ;;  %v969_v23 = vunpack.i.h.bf16 %v967_v9  ;;  %v968_v24 = vunpack.i.l.bf16 %v967_v9 }
  0xa8   : > { %v958_v14 = vunpack.i.h.bf16 %v956_v1  ;;  %v957_v15 = vunpack.i.l.bf16 %v956_v1 }
  0xaa   : > { %v334_v21 = vsel %vm323_vm6, %v957_v15, %v321_v19  ;;  %v335_v22 = vsel %vm323_vm6, %v958_v14, %v322_v20 }
  0xab   : > { %v979_v25 = vpop.permute.xlu0 %978 }
  0xac   : > { %v962_v6 = vpop.permute.xlu1 %961  ;;  %v981_v33 = vunpack.i.h.bf16 %v979_v25  ;;  %v980_v34 = vunpack.i.l.bf16 %v979_v25 }
  0xad   : > { %v964_v16 = vunpack.i.h.bf16 %v962_v6  ;;  %v963_v17 = vunpack.i.l.bf16 %v962_v6 }
  0xaf   : > { %v345_v26 = vsel %vm336_vm7, %v963_v17, %v334_v21  ;;  %v346_v27 = vsel %vm336_vm7, %v964_v16, %v335_v22 }
  0xb0   : > { %v357_v31 = vsel %vm347_vm8, %v969_v23, %v346_v27  ;;  %v356_v32 = vsel %vm347_vm8, %v968_v24, %v345_v26  ;;  %v997_v35 = vpop.permute.xlu0 %996 }
  0xb1   : > { %v973_v18 = vpop.permute.xlu1 %972  ;;  %v999_v41 = vunpack.i.h.bf16 %v997_v35  ;;  %v998_v42 = vunpack.i.l.bf16 %v997_v35 }
  0xb2   : > { %v975_v28 = vunpack.i.h.bf16 %v973_v18  ;;  %v974_v29 = vunpack.i.l.bf16 %v973_v18 }
  0xb4   : > { %v367_v36 = vsel %vm358_vm9, %v974_v29, %v356_v32  ;;  %v368_v37 = vsel %vm358_vm9, %v975_v28, %v357_v31 }
  0xb5   : > { %v378_v43 = vsel %vm369_vm10, %v980_v34, %v367_v36  ;;  %v379_v44 = vsel %vm369_vm10, %v981_v33, %v368_v37 }
  0xb6   : > { %v985_v30 = vpop.permute.xlu1 %984 }
  0xb7   : > { %v987_v38 = vunpack.i.h.bf16 %v985_v30  ;;  %v986_v39 = vunpack.i.l.bf16 %v985_v30 }
  0xb9   : > { %v389_v47 = vsel %vm380_vm11, %v986_v39, %v378_v43  ;;  %v390_v48 = vsel %vm380_vm11, %v987_v38, %v379_v44 }
  0xbb   : > { %v991_v40 = vpop.permute.xlu1 %990 }
  0xbc   : > { %v993_v45 = vunpack.i.h.bf16 %v991_v40  ;;  %v992_v46 = vunpack.i.l.bf16 %v991_v40 }
  0xbe   : > { %v400_v49 = vsel %vm391_vm12, %v992_v46, %v389_v47  ;;  %v401_v50 = vsel %vm391_vm12, %v993_v45, %v390_v48 }
  0xbf   : > { %v411_v51 = vsel %vm402_vm13, %v998_v42, %v400_v49  ;;  %v412_v52 = vsel %vm402_vm13, %v999_v41, %v401_v50 }
  0xc0   : > { %795 = vmatprep.mubr.f32.mxu0 %v411_v51 }
  0xc1   : > { %796 = vmatmul.mubr.f32.vlgmr.msra.gmra.mrb[0].mxu0 %v412_v52 }
 0x194   : > { %v797_v57 = vpop.f32.mrb[0].mxu0 }
 0x195   : > { %v508_v58 = vadd.f32 %v797_v57, %v719_v56  ;;  %v502_v59 = vpop.f32.mrb[1].mxu0 }
 0x196   : > { %v503_v60 = vadd.f32 %v719_v56, %v502_v59 }
 0x197   : > { %v512_v62 = vmax.f32 %v508_v58, 0.0 }
 0x198   : > { %v511_v61 = vmax.f32 %v503_v60, 0.0 }
 0x19a   : > { %830 = vmatprep.mubr.f32.mxu1 %v511_v61 }
 0x19b   : > { %831 = vmatmul.mubr.f32.vlgmr.msra.gmra.mrb[0].mxu1 %v512_v62 }
 0x26e   : > { %v832_v0 = vpop.f32.mrb[0].mxu1 }
 0x26f   : > { %v608_v1 = vadd.f32 %v832_v0, %v720_v63  ;;  %v602_v2 = vpop.f32.mrb[1].mxu1 }
 0x270   : > { %v603_v3 = vadd.f32 %v720_v63, %v602_v2 }
 0x271   : > { %v612_v4 = vmax.f32 %v608_v1, 0.0 }
 0x272   : > { %v611_v5 = vmax.f32 %v603_v3, 0.0 }
 0x273   : > { %615 = vst.msk [vmem:[%s261_s12 + $0x8] sm:$0xff] %vm613_vm14, %v612_v4 }
 0x274   : > { %614 = vst.msk [vmem:[%s261_s12] sm:$0xff] %vm613_vm14, %v611_v5 }
 0x275   : > { %1013 = shalt.err (!%p1010_p3)
}
 0x276   : > { %s1014_s28 = scalar_lea.hbm %s1295_s17, 256  ;;  %s1018_s10 = scalar_lea.hbm %s1344_s6, 512 }
 0x277   : > { %p1015_p4 = scmp.ne.s32.totalorder %s1295_s17, %s1014_s28  ;;  %p1019_p9 = scmp.lt.u32.totalorder %s1295_s17, %s1344_s6 }
 0x278   : > { %p1020_p10 = scmp.lt.u32.totalorder %s1018_s10, %s1014_s28  ;;  %p1022_p12 = scmp.lt.u32.totalorder %s1014_s28, %s1295_s17 }
 0x279   : > { %p1016_p7 = pnand %p1015_p4, %p1149_p5 }
 0x27a   : > { %p1021_p11 = por %p1020_p10, %p1019_p9 }
 0x27b   : > { %p1017_p8 = pneg %p1016_p7 }
 0x27c   : > { %p1023_p13 = por %p1022_p12, %p1021_p11 }
 0x27e   : > { %p1024_p0 = pnand %p1023_p13, %p1017_p8 }
 0x280   : > { %1027 = shalt.err (!%p1024_p0)
}
 0x281   : > { %s1074_s14 = smov 128   ;;  %s1075_s15 = smov 8  }
 0x282   : > { %897 = dma.vmem_to_hbm [thread:$0]  (%p1149_p5), %s1290_s13, 256, %s1295_s17, %s1297_s18, %s1074_s14, %s1074_s14, %s1075_s15  }
 0x283 PF: > { %p903_p1 = scmp.ge.s32.totalorder %s1062_s24, 2  ;;  %s645_s16 = sand.u32 1, %s1050_s21  }
 0x284   : > { %s646_s25 = scalar_lea.sflag [#allocation3], %s645_s16 }
 0x285   : > { %p900_p2 = pnand %p903_p1, %p1153_p6 }
 0x287   : > { %1045 = dma.done.wait (!%p900_p2), %s646_s25, 256  }
 0x288   : > { %1047 = vsyncadd (!%p900_p2), %s646_s25, 4294967040  ;;  %p16_p3 = scmp.ge.s32.totalorder %s1136_s27, 4   ;;  %s1347_s21 = smov %s1054_s22 }
 0x289   : > { %s1348_s22 = smov %s1058_s23  ;;  %s1349_s23 = smov %s1147_s30 }
 0x28a   : > { %s1350_s24 = smov %s1136_s27  ;;  %18 = sbr.rel (!%p16_p3) target bundleno = 3 (0x3), region = 82 }
 0x291   :  { %651 = vsyncpa [#allocation3], 1 }
 0x292   :  { %653 = vsyncpa [#allocation3 + $0x1], 1 }

</bundles_post_ra>
